<compile_context>
chip_gen: v5e
topology: v5e:2x2
jax: 0.10.0
libtpu: 0.0.40
codegen_flags: <defaults>
</compile_context>

<pallas_src>
import math

import jax
import jax.numpy as jnp
from jax.experimental import pallas as pl
from jax.experimental.pallas import tpu as pltpu

LEAK = 0.1
BN_EPS = 1e-5


def _leaky(h):
    # 0 < LEAK < 1  =>  max(h, LEAK*h) == LeakyReLU(h)
    return jnp.maximum(h, LEAK * h)


def _make_kernel(H, D, G, use_bf16):
    """Kernel for one tile of TN = D*G flattened samples (G whole batch rows).

    Lane order inside the tile is dimension-major: lane n = d*G + g."""

    def mm(w_ref, h):
        if use_bf16:
            h = h.astype(jnp.bfloat16)
        return jnp.dot(w_ref[...], h, preferred_element_type=jnp.float32)

    def kernel(x_ref, w1_ref, w2_ref, w3_ref, w4_ref, w5_ref, b_ref, o_ref):
        x = x_ref[...]                                       # (1, TN), lane-dense
        # layer1: Linear(1, H) (+ folded BN) is an outer product -> VPU broadcast
        h = _leaky(w1_ref[...] * x + b_ref[0:H, 0:1])        # (H, TN)
        # layer2..4 on the MXU: W^T @ h, MXU N-dim = tile width
        h = _leaky(mm(w2_ref, h) + b_ref[:, 1:2])            # (2H, TN)
        h = _leaky(mm(w3_ref, h) + b_ref[:, 2:3])            # (2H, TN)
        h = _leaky(mm(w4_ref, h) + b_ref[0:H, 3:4])          # (H, TN)
        # output_layer: Linear(H, 1) -> one scalar per flattened sample
        pre = mm(w5_ref, h)                                  # (1, TN)

        # Fused sum over the D per-dimension subnet outputs of each batch row.
        # d-major lane order => lanes [d*G, (d+1)*G) hold dimension d for all G rows,
        # so the reduction is D-1 lane-aligned (1, G) adds (no selection matrix).
        acc = pre[:, 0:G]
        for d in range(1, D):
            acc = acc + pre[:, d * G:(d + 1) * G]
        o_ref[...] = acc + D * b_ref[0:1, 4:5]               # (1, G)

    return kernel


def init_raw_params(key, hidden_size):
    """Raw (unfolded) parameters matching the PyTorch module in eval mode."""
    H = hidden_size
    dims = [(1, H), (H, 2 * H), (2 * H, 2 * H), (2 * H, H)]
    keys = iter(jax.random.split(key, 6 * len(dims) + 2))
    layers = []
    for fan_in, fan_out in dims:
        bound = 1.0 / math.sqrt(fan_in)
        W = jax.random.uniform(next(keys), (fan_in, fan_out), jnp.float32, -bound, bound)
        b = jax.random.uniform(next(keys), (fan_out,), jnp.float32, -bound, bound)
        gamma = jax.random.uniform(next(keys), (fan_out,), jnp.float32, 0.5, 1.5)
        beta = 0.1 * jax.random.normal(next(keys), (fan_out,), jnp.float32)
        mean = 0.1 * jax.random.normal(next(keys), (fan_out,), jnp.float32)
        var = jax.random.uniform(next(keys), (fan_out,), jnp.float32, 0.5, 1.5)
        layers.append((W, b, gamma, beta, mean, var))
    bound = 1.0 / math.sqrt(H)
    W5 = jax.random.uniform(next(keys), (H, 1), jnp.float32, -bound, bound)
    b5 = jax.random.uniform(next(keys), (1,), jnp.float32, -bound, bound)
    return layers, (W5, b5)


def pack_params(layers, out_layer, use_bf16=True):
    """Fold eval-mode BatchNorm into the Linears and pack for the kernel.

    Returns (w1, w2, w3, w4, w5, b_all):
      wK = transposed BN-folded weight (fan_out, fan_in); w2..w5 are cast to bf16 once
      here when use_bf16 (MXU operands, f32 accumulation in-kernel); w1 stays f32
      (layer 1 is a VPU outer product).  b_all is a (2H, 5) f32 column-packed bias
      table (layers 1-4 folded biases in cols 0-3, output bias at [0, 4])."""
    H = layers[0][0].shape[1]
    wts, biases = [], []
    for W, b, gamma, beta, mean, var in layers:
        scale = gamma / jnp.sqrt(var + BN_EPS)
        shift = beta - mean * scale
        wts.append((W * scale[None, :]).T)                       # (fan_out, fan_in)
        biases.append((b * scale + shift).astype(jnp.float32))   # (fan_out,)
    W5, b5 = out_layer
    mm_dtype = jnp.bfloat16 if use_bf16 else jnp.float32
    w1 = wts[0].astype(jnp.float32)
    w2 = wts[1].astype(mm_dtype)
    w3 = wts[2].astype(mm_dtype)
    w4 = wts[3].astype(mm_dtype)
    w5 = W5.T.astype(mm_dtype)                                   # (1, H)
    b_all = jnp.zeros((2 * H, 5), jnp.float32)
    b_all = b_all.at[:H, 0].set(biases[0])
    b_all = b_all.at[:, 1].set(biases[1])
    b_all = b_all.at[:, 2].set(biases[2])
    b_all = b_all.at[:H, 3].set(biases[3])
    b_all = b_all.at[0, 4].set(b5[0])
    return (w1, w2, w3, w4, w5, b_all)


def _choose_tiling(B, D, target_lanes=8192):
    """Pick (G rows/tile, padded batch).

    Multi-tile path: G is a multiple of 128 (lane-dense (1, G) output blocks; the
    (1, G*D) input block is then automatically 128-aligned), and we guarantee >= 2
    grid steps so the 'parallel' axis can shard across both v7x TensorCores.
    Small batches (< 256 rows) use a single full-array tile (block == full array, no
    alignment constraint) instead of padding the batch several-fold."""
    if B < 256:
        return B, B
    g = max(128, ((target_lanes // max(D, 1)) // 128) * 128)
    num_tiles = max(2, (B + g - 1) // g)
    g = max(128, (((B + num_tiles - 1) // num_tiles) + 127) // 128 * 128)
    b_pad = ((B + g - 1) // g) * g
    return g, b_pad


def auto_decomposed_forward(x, packed_params, *, target_lanes=8192):
    """Equivalent of AutoDecomposedNetwork.forward(x) (current_dim=None), eval mode."""
    B, D = x.shape
    w1, w2, w3, w4, w5, b_all = packed_params
    H = w1.shape[0]
    use_bf16 = (w2.dtype == jnp.bfloat16)

    G, B_pad = _choose_tiling(B, D, target_lanes)
    num_tiles = B_pad // G
    TN = G * D
    assert num_tiles * G == B_pad
    assert num_tiles == 1 or (G % 128 == 0 and TN % 128 == 0), (G, TN)

    x_pad = x if B_pad == B else jnp.pad(x, ((0, B_pad - B), (0, 0)))
    # Dimension-major lane order within each tile: lane n = d*G + g.
    x_flat = (x_pad.astype(jnp.float32)
              .reshape(num_tiles, G, D)
              .transpose(0, 2, 1)
              .reshape(1, B_pad * D))

    # Explicit scoped-VMEM budget (v5e default is only 16 MiB); footprint here is a
    # handful of (2H, TN) activation temporaries plus the double-buffered x tile.
    act_bytes = (2 * H) * TN * 4
    param_bytes = sum(int(a.size) * a.dtype.itemsize
                      for a in (w1, w2, w3, w4, w5, b_all))
    est = 12 * act_bytes + 4 * TN * 4 + 2 * param_bytes + (2 << 20)
    vmem_limit = int(min(64 << 20, max(32 << 20, est)))

    kernel = _make_kernel(H, D, G, use_bf16)
    out = pl.pallas_call(
        kernel,
        out_shape=jax.ShapeDtypeStruct((1, B_pad), jnp.float32),
        grid=(num_tiles,),
        in_specs=[
            pl.BlockSpec((1, TN), lambda t: (0, t)),        # x tile (lane-dense)
            pl.BlockSpec(w1.shape, lambda t: (0, 0)),       # params: full blocks,
            pl.BlockSpec(w2.shape, lambda t: (0, 0)),       # resident across steps
            pl.BlockSpec(w3.shape, lambda t: (0, 0)),
            pl.BlockSpec(w4.shape, lambda t: (0, 0)),
            pl.BlockSpec(w5.shape, lambda t: (0, 0)),
            pl.BlockSpec(b_all.shape, lambda t: (0, 0)),
        ],
        out_specs=pl.BlockSpec((1, G), lambda t: (0, t)),   # per-batch-row sums
        compiler_params=pltpu.CompilerParams(
            dimension_semantics=("parallel",),              # v7x megacore sharding
            vmem_limit_bytes=vmem_limit),
    )(x_flat, w1, w2, w3, w4, w5, b_all)
    return out.reshape(B_pad, 1)[:B]


def reference_forward(x, layers, out_layer):
    """Pure-JAX reference using the raw (unfolded) parameters (eval-mode BN, no dropout)."""
    B, D = x.shape
    h = x.reshape(-1, 1)
    for W, b, gamma, beta, mean, var in layers:
        z = h @ W + b
        z = (z - mean) / jnp.sqrt(var + BN_EPS) * gamma + beta
        h = jnp.where(z >= 0, z, LEAK * z)
    W5, b5 = out_layer
    y = h @ W5 + b5
    return jnp.sum(y.reshape(B, D), axis=1, keepdims=True)


if __name__ == "__main__":
    key = jax.random.PRNGKey(0)
    kx, kp = jax.random.split(key)

    B, D, H = 8, 16, 32            # batch=8, input_dim=16, hidden_size=32
    x = jax.random.normal(kx, (B, D), jnp.float32)
    layers, out_layer = init_raw_params(kp, H)
    ref = reference_forward(x, layers, out_layer)

    # f32 MXU operands: strict check against the f32 reference (single-tile path).
    packed_f32 = pack_params(layers, out_layer, use_bf16=False)
    out_f32 = auto_decomposed_forward(x, packed_f32)
    jax.block_until_ready(out_f32)
    assert out_f32.shape == (B, 1), out_f32.shape
    assert jnp.allclose(out_f32, ref, atol=1e-3, rtol=1e-3), (out_f32, ref)

    # bf16 MXU operands (default packing): looser tolerance — weight/activation
    # rounding error is summed over the D per-dimension subnet outputs.
    packed_bf16 = pack_params(layers, out_layer)
    out_bf16 = auto_decomposed_forward(x, packed_bf16)
    jax.block_until_ready(out_bf16)
    bf16_tol = 5e-2 * (float(jnp.max(jnp.abs(ref))) + float(D))
    assert float(jnp.max(jnp.abs(out_bf16 - ref))) < bf16_tol, (out_bf16, ref)

    # Non-dividing batch: exercises batch padding + the multi-tile "parallel" grid.
    B2 = 300
    x2 = jax.random.normal(jax.random.fold_in(kx, 1), (B2, D), jnp.float32)
    ref2 = reference_forward(x2, layers, out_layer)
    out2 = auto_decomposed_forward(x2, packed_f32)
    jax.block_until_ready(out2)
    assert out2.shape == (B2, 1), out2.shape
    assert jnp.allclose(out2, ref2, atol=1e-3, rtol=1e-3), (out2, ref2)

    print("KERNEL_OK")
</pallas_src>

<mosaic_0001>
module attributes {stable_mosaic.version = 11 : i64} {
  func.func @kernel(%arg0: i32, %arg1: memref<1x128xf32, #tpu.memory_space<vmem>>, %arg2: memref<32x1xf32, #tpu.memory_space<vmem>>, %arg3: memref<64x32xf32, #tpu.memory_space<vmem>>, %arg4: memref<64x64xf32, #tpu.memory_space<vmem>>, %arg5: memref<32x64xf32, #tpu.memory_space<vmem>>, %arg6: memref<1x32xf32, #tpu.memory_space<vmem>>, %arg7: memref<64x5xf32, #tpu.memory_space<vmem>>, %arg8: memref<1x8xf32, #tpu.memory_space<vmem>>) attributes {dimension_semantics = [#tpu.dimension_semantics<parallel>], iteration_bounds = array<i64: 1>, scalar_prefetch = 0 : i64, scratch_operands = 0 : i64, tpu.core_type = #tpu.core_type<tc>, window_params = [{transform_indices = @transform_0, window_bounds = array<i64: 1, 128>}, {pipeline_mode = #tpu.pipeline_mode<synchronous>, transform_indices = @transform_1, window_bounds = array<i64: 32, 1>}, {pipeline_mode = #tpu.pipeline_mode<synchronous>, transform_indices = @transform_2, window_bounds = array<i64: 64, 32>}, {pipeline_mode = #tpu.pipeline_mode<synchronous>, transform_indices = @transform_3, window_bounds = array<i64: 64, 64>}, {pipeline_mode = #tpu.pipeline_mode<synchronous>, transform_indices = @transform_4, window_bounds = array<i64: 32, 64>}, {pipeline_mode = #tpu.pipeline_mode<synchronous>, transform_indices = @transform_5, window_bounds = array<i64: 1, 32>}, {pipeline_mode = #tpu.pipeline_mode<synchronous>, transform_indices = @transform_6, window_bounds = array<i64: 64, 5>}, {transform_indices = @transform_7, window_bounds = array<i64: 1, 8>}]} {
    %c0 = arith.constant 0 : index
    %c0_0 = arith.constant 0 : index
    %0 = vector.load %arg1[%c0, %c0_0] : memref<1x128xf32, #tpu.memory_space<vmem>>, vector<1x128xf32>
    %c0_1 = arith.constant 0 : index
    %c0_2 = arith.constant 0 : index
    %1 = vector.load %arg2[%c0_1, %c0_2] : memref<32x1xf32, #tpu.memory_space<vmem>>, vector<32x1xf32>
    %2 = vector.broadcast %1 : vector<32x1xf32> to vector<32x128xf32>
    %3 = vector.broadcast %0 : vector<1x128xf32> to vector<32x128xf32>
    %4 = arith.mulf %2, %3 : vector<32x128xf32>
    %c0_3 = arith.constant 0 : index
    %c0_4 = arith.constant 0 : index
    %5 = vector.load %arg7[%c0_3, %c0_4] : memref<64x5xf32, #tpu.memory_space<vmem>>, vector<32x1xf32>
    %6 = vector.broadcast %5 : vector<32x1xf32> to vector<32x128xf32>
    %7 = arith.addf %4, %6 : vector<32x128xf32>
    %cst = arith.constant 1.000000e-01 : f32
    %8 = vector.broadcast %cst : f32 to vector<32x128xf32>
    %9 = arith.mulf %8, %7 : vector<32x128xf32>
    %10 = arith.maximumf %7, %9 : vector<32x128xf32>
    %c0_5 = arith.constant 0 : index
    %c0_6 = arith.constant 0 : index
    %11 = vector.load %arg3[%c0_5, %c0_6] : memref<64x32xf32, #tpu.memory_space<vmem>>, vector<64x32xf32>
    %cst_7 = arith.constant dense<0.000000e+00> : vector<64x128xf32>
    %12 = tpu.matmul %11, %10, %cst_7 {dimension_numbers = #tpu.dot_dimension_numbers<[1], [0], [0], [1], [0, 0, 1, 1], [], []>} : vector<64x32xf32>, vector<32x128xf32>, vector<64x128xf32> -> vector<64x128xf32>
    %c0_8 = arith.constant 0 : index
    %c1 = arith.constant 1 : index
    %13 = vector.load %arg7[%c0_8, %c1] : memref<64x5xf32, #tpu.memory_space<vmem>>, vector<64x1xf32>
    %14 = vector.broadcast %13 : vector<64x1xf32> to vector<64x128xf32>
    %15 = arith.addf %12, %14 : vector<64x128xf32>
    %cst_9 = arith.constant 1.000000e-01 : f32
    %16 = vector.broadcast %cst_9 : f32 to vector<64x128xf32>
    %17 = arith.mulf %16, %15 : vector<64x128xf32>
    %18 = arith.maximumf %15, %17 : vector<64x128xf32>
    %c0_10 = arith.constant 0 : index
    %c0_11 = arith.constant 0 : index
    %19 = vector.load %arg4[%c0_10, %c0_11] : memref<64x64xf32, #tpu.memory_space<vmem>>, vector<64x64xf32>
    %cst_12 = arith.constant dense<0.000000e+00> : vector<64x128xf32>
    %20 = tpu.matmul %19, %18, %cst_12 {dimension_numbers = #tpu.dot_dimension_numbers<[1], [0], [0], [1], [0, 0, 1, 1], [], []>} : vector<64x64xf32>, vector<64x128xf32>, vector<64x128xf32> -> vector<64x128xf32>
    %c0_13 = arith.constant 0 : index
    %c2 = arith.constant 2 : index
    %21 = vector.load %arg7[%c0_13, %c2] : memref<64x5xf32, #tpu.memory_space<vmem>>, vector<64x1xf32>
    %22 = vector.broadcast %21 : vector<64x1xf32> to vector<64x128xf32>
    %23 = arith.addf %20, %22 : vector<64x128xf32>
    %cst_14 = arith.constant 1.000000e-01 : f32
    %24 = vector.broadcast %cst_14 : f32 to vector<64x128xf32>
    %25 = arith.mulf %24, %23 : vector<64x128xf32>
    %26 = arith.maximumf %23, %25 : vector<64x128xf32>
    %c0_15 = arith.constant 0 : index
    %c0_16 = arith.constant 0 : index
    %27 = vector.load %arg5[%c0_15, %c0_16] : memref<32x64xf32, #tpu.memory_space<vmem>>, vector<32x64xf32>
    %cst_17 = arith.constant dense<0.000000e+00> : vector<32x128xf32>
    %28 = tpu.matmul %27, %26, %cst_17 {dimension_numbers = #tpu.dot_dimension_numbers<[1], [0], [0], [1], [0, 0, 1, 1], [], []>} : vector<32x64xf32>, vector<64x128xf32>, vector<32x128xf32> -> vector<32x128xf32>
    %c0_18 = arith.constant 0 : index
    %c3 = arith.constant 3 : index
    %29 = vector.load %arg7[%c0_18, %c3] : memref<64x5xf32, #tpu.memory_space<vmem>>, vector<32x1xf32>
    %30 = vector.broadcast %29 : vector<32x1xf32> to vector<32x128xf32>
    %31 = arith.addf %28, %30 : vector<32x128xf32>
    %cst_19 = arith.constant 1.000000e-01 : f32
    %32 = vector.broadcast %cst_19 : f32 to vector<32x128xf32>
    %33 = arith.mulf %32, %31 : vector<32x128xf32>
    %34 = arith.maximumf %31, %33 : vector<32x128xf32>
    %c0_20 = arith.constant 0 : index
    %c0_21 = arith.constant 0 : index
    %35 = vector.load %arg6[%c0_20, %c0_21] : memref<1x32xf32, #tpu.memory_space<vmem>>, vector<1x32xf32>
    %cst_22 = arith.constant dense<0.000000e+00> : vector<1x128xf32>
    %36 = tpu.matmul %35, %34, %cst_22 {dimension_numbers = #tpu.dot_dimension_numbers<[1], [0], [0], [1], [0, 0, 1, 1], [], []>} : vector<1x32xf32>, vector<32x128xf32>, vector<1x128xf32> -> vector<1x128xf32>
    %37 = vector.extract_strided_slice %36 {offsets = [0, 0], sizes = [1, 8], strides = [1, 1]} : vector<1x128xf32> to vector<1x8xf32>
    %38 = vector.extract_strided_slice %36 {offsets = [0, 8], sizes = [1, 8], strides = [1, 1]} : vector<1x128xf32> to vector<1x8xf32>
    %39 = arith.addf %37, %38 : vector<1x8xf32>
    %40 = vector.extract_strided_slice %36 {offsets = [0, 16], sizes = [1, 8], strides = [1, 1]} : vector<1x128xf32> to vector<1x8xf32>
    %41 = arith.addf %39, %40 : vector<1x8xf32>
    %42 = vector.extract_strided_slice %36 {offsets = [0, 24], sizes = [1, 8], strides = [1, 1]} : vector<1x128xf32> to vector<1x8xf32>
    %43 = arith.addf %41, %42 : vector<1x8xf32>
    %44 = vector.extract_strided_slice %36 {offsets = [0, 32], sizes = [1, 8], strides = [1, 1]} : vector<1x128xf32> to vector<1x8xf32>
    %45 = arith.addf %43, %44 : vector<1x8xf32>
    %46 = vector.extract_strided_slice %36 {offsets = [0, 40], sizes = [1, 8], strides = [1, 1]} : vector<1x128xf32> to vector<1x8xf32>
    %47 = arith.addf %45, %46 : vector<1x8xf32>
    %48 = vector.extract_strided_slice %36 {offsets = [0, 48], sizes = [1, 8], strides = [1, 1]} : vector<1x128xf32> to vector<1x8xf32>
    %49 = arith.addf %47, %48 : vector<1x8xf32>
    %50 = vector.extract_strided_slice %36 {offsets = [0, 56], sizes = [1, 8], strides = [1, 1]} : vector<1x128xf32> to vector<1x8xf32>
    %51 = arith.addf %49, %50 : vector<1x8xf32>
    %52 = vector.extract_strided_slice %36 {offsets = [0, 64], sizes = [1, 8], strides = [1, 1]} : vector<1x128xf32> to vector<1x8xf32>
    %53 = arith.addf %51, %52 : vector<1x8xf32>
    %54 = vector.extract_strided_slice %36 {offsets = [0, 72], sizes = [1, 8], strides = [1, 1]} : vector<1x128xf32> to vector<1x8xf32>
    %55 = arith.addf %53, %54 : vector<1x8xf32>
    %56 = vector.extract_strided_slice %36 {offsets = [0, 80], sizes = [1, 8], strides = [1, 1]} : vector<1x128xf32> to vector<1x8xf32>
    %57 = arith.addf %55, %56 : vector<1x8xf32>
    %58 = vector.extract_strided_slice %36 {offsets = [0, 88], sizes = [1, 8], strides = [1, 1]} : vector<1x128xf32> to vector<1x8xf32>
    %59 = arith.addf %57, %58 : vector<1x8xf32>
    %60 = vector.extract_strided_slice %36 {offsets = [0, 96], sizes = [1, 8], strides = [1, 1]} : vector<1x128xf32> to vector<1x8xf32>
    %61 = arith.addf %59, %60 : vector<1x8xf32>
    %62 = vector.extract_strided_slice %36 {offsets = [0, 104], sizes = [1, 8], strides = [1, 1]} : vector<1x128xf32> to vector<1x8xf32>
    %63 = arith.addf %61, %62 : vector<1x8xf32>
    %64 = vector.extract_strided_slice %36 {offsets = [0, 112], sizes = [1, 8], strides = [1, 1]} : vector<1x128xf32> to vector<1x8xf32>
    %65 = arith.addf %63, %64 : vector<1x8xf32>
    %66 = vector.extract_strided_slice %36 {offsets = [0, 120], sizes = [1, 8], strides = [1, 1]} : vector<1x128xf32> to vector<1x8xf32>
    %67 = arith.addf %65, %66 : vector<1x8xf32>
    %c0_23 = arith.constant 0 : index
    %c4 = arith.constant 4 : index
    %68 = vector.load %arg7[%c0_23, %c4] : memref<64x5xf32, #tpu.memory_space<vmem>>, vector<1x1xf32>
    %cst_24 = arith.constant 1.600000e+01 : f32
    %69 = vector.broadcast %cst_24 : f32 to vector<1x1xf32>
    %70 = arith.mulf %69, %68 : vector<1x1xf32>
    %71 = vector.broadcast %70 : vector<1x1xf32> to vector<1x8xf32>
    %72 = arith.addf %67, %71 : vector<1x8xf32>
    %c0_25 = arith.constant 0 : index
    %c0_26 = arith.constant 0 : index
    %73 = vector.load %arg8[%c0_25, %c0_26] : memref<1x8xf32, #tpu.memory_space<vmem>>, vector<1x8xf32>
    tpu.vector_store %arg8[%c0_25, %c0_26], %72 {strides = array<i32>} : memref<1x8xf32, #tpu.memory_space<vmem>>, vector<1x8xf32>,
    return
  }
  func.func @transform_0(%arg0: i32) -> (i32, i32) {
    %c0_i32 = arith.constant 0 : i32
    %c0_i32_0 = arith.constant 0 : i32
    return %c0_i32, %arg0 : i32, i32
  }
  func.func @transform_1(%arg0: i32) -> (i32, i32) {
    %c0_i32 = arith.constant 0 : i32
    %c0_i32_0 = arith.constant 0 : i32
    %c0_i32_1 = arith.constant 0 : i32
    return %c0_i32, %c0_i32_0 : i32, i32
  }
  func.func @transform_2(%arg0: i32) -> (i32, i32) {
    %c0_i32 = arith.constant 0 : i32
    %c0_i32_0 = arith.constant 0 : i32
    %c0_i32_1 = arith.constant 0 : i32
    return %c0_i32, %c0_i32_0 : i32, i32
  }
  func.func @transform_3(%arg0: i32) -> (i32, i32) {
    %c0_i32 = arith.constant 0 : i32
    %c0_i32_0 = arith.constant 0 : i32
    %c0_i32_1 = arith.constant 0 : i32
    return %c0_i32, %c0_i32_0 : i32, i32
  }
  func.func @transform_4(%arg0: i32) -> (i32, i32) {
    %c0_i32 = arith.constant 0 : i32
    %c0_i32_0 = arith.constant 0 : i32
    %c0_i32_1 = arith.constant 0 : i32
    return %c0_i32, %c0_i32_0 : i32, i32
  }
  func.func @transform_5(%arg0: i32) -> (i32, i32) {
    %c0_i32 = arith.constant 0 : i32
    %c0_i32_0 = arith.constant 0 : i32
    %c0_i32_1 = arith.constant 0 : i32
    return %c0_i32, %c0_i32_0 : i32, i32
  }
  func.func @transform_6(%arg0: i32) -> (i32, i32) {
    %c0_i32 = arith.constant 0 : i32
    %c0_i32_0 = arith.constant 0 : i32
    %c0_i32_1 = arith.constant 0 : i32
    return %c0_i32, %c0_i32_0 : i32, i32
  }
  func.func @transform_7(%arg0: i32) -> (i32, i32) {
    %c0_i32 = arith.constant 0 : i32
    %c0_i32_0 = arith.constant 0 : i32
    return %c0_i32, %arg0 : i32, i32
  }
}

</mosaic_0001>

<bundles_post_ra>
// kernel: tpu_custom_call.1
= control target key start
LH: loop header
LB: loop body
LE: loop exit
PB: predicated region body
PF: predicated region fallthrough
CT: control target
= control target key end

     0   :  { %v630_v2 = vmov 0   ;;  %s852_s0 = inlined_call_operand.vmem [shape: f32[1,128], index: 0, kind: input, shape index: {}]   ;;  %s853_s1 = inlined_call_operand.vmem [shape: f32[32,1], index: 1, kind: input, shape index: {}]   ;;  %s854_s2 = inlined_call_operand.vmem [shape: f32[64,32], index: 2, kind: input, shape index: {}]   ;;  %s855_s3 = inlined_call_operand.vmem [shape: f32[64,64], index: 3, kind: input, shape index: {}]   ;;  %s856_s4 = inlined_call_operand.vmem [shape: f32[32,64], index: 4, kind: input, shape index: {}]   ;;  %s857_s5 = inlined_call_operand.vmem [shape: f32[1,32], index: 5, kind: input, shape index: {}]   ;;  %s858_s6 = inlined_call_operand.vmem [shape: f32[64,5], index: 6, kind: input, shape index: {}]   ;;  %s859_s7 = inlined_call_operand.hbm [shape: f32[1,8], index: 7, kind: output, shape index: {}]  }
   0x1   :  { %v694_v0 = vld [vmem:[%s858_s6 + $0x18] sm:$0xff]  ;;  %590 = vset.pattern.permute.xlu1 %v630_v2  ;;  %589 = vset.pattern.permute.xlu0 %v630_v2  ;;  %v703_v3 = vld [vmem:[%s858_s6 + $0x10] sm:$0xff] }
   0x2   :  { %v31_v1 = vld [vmem:[%s853_s1 + $0x18] sm:$0xff]  ;;  %80 = vperm.xlu1 %590, %v694_v0   ;;  %591 = vset.pattern.permute.xlu2 %v630_v2 }
   0x3   :  { %49 = vperm.xlu0 %589, %v31_v1  }
   0x4   :  { %12 = vsyncpa [#allocation3], 0  ;;  %75 = vperm.xlu2 %591, %v703_v3   ;;  %v30_v4 = vld [vmem:[%s853_s1 + $0x10] sm:$0xff]  ;;  %v29_v5 = vld [vmem:[%s853_s1 + $0x8] sm:$0xff]  ;;  %v631_v10 = vmov 1   ;;  %vm151_vm0 = vcmask 261120  }
   0x5   :  { %v28_v6 = vld [vmem:[%s853_s1] sm:$0xff]  ;;  %v718_v7 = vld [vmem:[%s858_s6 + $0x8] sm:$0xff]  ;;  %v740_v16 = vld [vmem:[%s858_s6 + $0x30] sm:$0xff]  ;;  %v632_v60 = vmov 2   ;;  %vm273_vm1 = vcmask 523264   ;;  %s634_s16 = smov 104  }
   0x6   :  { %v723_v8 = vld [vmem:[%s858_s6] sm:$0xff]  ;;  %v730_v9 = vld [vmem:[%s858_s6 + $0x28] sm:$0xff]  ;;  %v101_v38 = vld [vmem:[%s854_s2 + $0x30] sm:$0xff]  ;;  %s635_s17 = smov 112   ;;  %s638_s18 = smov 80   ;;  %vm517_vm2 = vcmask 57344  }
   0x7   :  { %v603_v11 = vld [vmem:[%s852_s0] ss:$0 sm:$0xff]  ;;  %v110_v39 = vld [vmem:[%s858_s6 + $0x38] sm:$0xff]  ;;  %v96_v40 = vld [vmem:[%s854_s2 + $0x8] sm:$0xff]  ;;  %s639_s1 = smov 88   ;;  %s640_s19 = smov 96  }
   0x8   :  { %v95_v37 = vld [vmem:[%s854_s2] sm:$0xff]  ;;  %v102_v41 = vld [vmem:[%s854_s2 + $0x38] sm:$0xff]  ;;  %v97_v43 = vld [vmem:[%s854_s2 + $0x10] sm:$0xff]  ;;  %s642_s20 = smov 64   ;;  %s643_s21 = smov 72  }
   0x9   :  { %v107_v42 = vld [vmem:[%s858_s6 + $0x20] sm:$0xff]  ;;  %v98_v44 = vld [vmem:[%s854_s2 + $0x18] sm:$0xff]  ;;  %v100_v46 = vld [vmem:[%s854_s2 + $0x28] sm:$0xff]  ;;  %s644_s0 = smov 32   ;;  %s645_s22 = smov 40  }
   0xa   :  { %39 = vperm.xlu1 %590, %v29_v5   ;;  %v99_v45 = vld [vmem:[%s854_s2 + $0x20] sm:$0xff]  ;;  %s636_s2 = smov 120   ;;  %s646_s23 = smov 48  }
   0xb   :  { %44 = vperm.xlu0 %589, %v30_v4   ;;  %s647_s24 = smov 8   ;;  %s648_s25 = smov 16  }
   0xc   :  { %34 = vperm.xlu2 %591, %v28_v6   ;;  %s649_s26 = smov 24   ;;  %s526_s8 = sshll.u32 %s859_s7, 4  ;;  %s527_s8 = int_to_ptr.hbm [resolvable:$true] %s526_s8 }
  0x12   :  { %65 = vperm.xlu1 %590, %v723_v8  }
  0x13   :  { %70 = vperm.xlu0 %589, %v718_v7  }
  0x14   :  { %592 = vset.pattern.permute.xlu2 %v631_v10 }
  0x15   :  { %148 = vperm.xlu2 %592, %v110_v39  }
  0x1a   :  { %594 = vset.pattern.permute.xlu1 %v631_v10 }
  0x1b   :  { %593 = vset.pattern.permute.xlu0 %v631_v10  ;;  %138 = vperm.xlu1 %594, %v730_v9  }
  0x1c   :  { %143 = vperm.xlu0 %593, %v740_v16  }
  0x1d   :  { %133 = vperm.xlu2 %592, %v107_v42  }
  0x23   :  { %128 = vperm.xlu1 %594, %v694_v0  }
  0x24   :  { %118 = vperm.xlu0 %593, %v718_v7  }
  0x25   :  { %123 = vperm.xlu2 %592, %v703_v3  }
  0x2b   :  { %113 = vperm.xlu1 %594, %v723_v8  }
  0x2c   :  { %596 = vset.pattern.permute.xlu0 %v632_v60 }
  0x2d   :  { %266 = vperm.xlu0 %596, %v740_v16   ;;  %595 = vset.pattern.permute.xlu2 %v632_v60 }
  0x2e   :  { %270 = vperm.xlu2 %595, %v110_v39  }
  0x33   :  { %597 = vset.pattern.permute.xlu1 %v632_v60 }
  0x34   :  { %262 = vperm.xlu1 %597, %v730_v9  }
  0x35   :  { %246 = vperm.xlu0 %596, %v718_v7  }
  0x36   :  { %258 = vperm.xlu2 %595, %v107_v42  }
  0x3c   :  { %254 = vperm.xlu1 %597, %v694_v0  }
  0x3e   :  { %250 = vperm.xlu2 %595, %v703_v3  }
  0x44   :  { %242 = vperm.xlu1 %597, %v723_v8  }
  0x5e   :  { %v76_v15 = vpop.permute.xlu2 %75 }
  0x66   :  { %v35_v24 = vpop.permute.xlu2 %34 }
  0x67   :  { %v55_v27 = vmul.f32 %v603_v11, %v35_v24 }
  0x6f   :  { %v149_v52 = vpop.permute.xlu2 %148 }
  0x74   :  { %v81_v12 = vpop.permute.xlu1 %80 }
  0x75   :  { %v50_v13 = vpop.permute.xlu0 %49 }
  0x76   :  { %v58_v14 = vmul.f32 %v603_v11, %v50_v13 }
  0x77   :  { %v134_v63 = vpop.permute.xlu2 %133 }
  0x78   :  { %v86_v17 = vadd.f32 %v81_v12, %v58_v14 }
  0x7a   :  { %v90_v18 = vmul.f32 0.1, %v86_v17 }
  0x7c   :  { %v94_v19 = vmax.f32 %v86_v17, %v90_v18  ;;  %v40_v21 = vpop.permute.xlu1 %39 }
  0x7d   :  { %v45_v20 = vpop.permute.xlu0 %44  ;;  %v56_v26 = vmul.f32 %v603_v11, %v40_v21 }
  0x7e   :  { %v57_v22 = vmul.f32 %v603_v11, %v45_v20  ;;  %188 = vmatpush.msra.mxu0 %v94_v19  ;;  %556 = vmatpush.msra.mxu2 %v94_v19 }
  0x7f   :  { %v124_v5 = vpop.permute.xlu2 %123 }
  0x80   :  { %v85_v23 = vadd.f32 %v76_v15, %v57_v22 }
  0x82   :  { %v89_v25 = vmul.f32 0.1, %v85_v23 }
  0x84   :  { %v93_v28 = vmax.f32 %v85_v23, %v89_v25  ;;  %v66_v30 = vpop.permute.xlu1 %65 }
  0x85   :  { %v71_v29 = vpop.permute.xlu0 %70  ;;  %v83_v32 = vadd.f32 %v66_v30, %v55_v27  ;;  %v234_v30 = vld [vmem:[%s855_s3 + $0x8] sm:$0xff] }
  0x86   :  { %v84_v31 = vadd.f32 %v71_v29, %v56_v26  ;;  %189 = vmatpush.msra.mxu0 %v93_v28  ;;  %557 = vmatpush.msra.mxu2 %v93_v28  ;;  %v233_v28 = vld [vmem:[%s855_s3] sm:$0xff]  ;;  %v238_v29 = vld [vmem:[%s855_s3 + $0x28] sm:$0xff] }
  0x87   :  { %v87_v34 = vmul.f32 0.1, %v83_v32 }
  0x88   :  { %v88_v33 = vmul.f32 0.1, %v84_v31  ;;  %v271_v39 = vpop.permute.xlu2 %270 }
  0x89   :  { %v91_v36 = vmax.f32 %v83_v32, %v87_v34  ;;  %v235_v32 = vld [vmem:[%s855_s3 + $0x10] sm:$0xff]  ;;  %v236_v34 = vld [vmem:[%s855_s3 + $0x18] sm:$0xff] }
  0x8a   :  { %v92_v35 = vmax.f32 %v84_v31, %v88_v33  ;;  %v239_v31 = vld [vmem:[%s855_s3 + $0x30] sm:$0xff]  ;;  %v240_v33 = vld [vmem:[%s855_s3 + $0x38] sm:$0xff] }
  0x8c   :  { %190 = vmatpush.msra.mxu0 %v92_v35  ;;  %558 = vmatpush.msra.mxu2 %v92_v35  ;;  %v237_v35 = vld [vmem:[%s855_s3 + $0x20] sm:$0xff] }
  0x8d   :  { %v139_v61 = vpop.permute.xlu1 %138 }
  0x8e   :  { %191 = vmatpush.msra.mxu0 %v91_v36  ;;  %559 = vmatpush.msra.mxu2 %v91_v36  ;;  %v144_v50 = vpop.permute.xlu0 %143 }
  0x8f   :  { %535 = vmatmul.msk.f32.vlgmr.msra.gmra.mxu0 %vm151_vm0, %v95_v37  ;;  %541 = vmatmul.msk.f32.vlgmr.msra.gmra.mxu2 %vm151_vm0, %v101_v38 }
  0x95   :  { %v129_v2 = vpop.permute.xlu1 %128 }
  0x96   :  { %v119_v11 = vpop.permute.xlu0 %118 }
  0x97   :  { %536 = vmatmul.msk.f32.gmra.mxu0 %vm151_vm0, %v96_v40  ;;  %542 = vmatmul.msk.f32.gmra.mxu2 %vm151_vm0, %v102_v41 }
  0x9d   :  { %v114_v15 = vpop.permute.xlu1 %113 }
  0x9f   :  { %537 = vmatmul.msk.f32.gmra.mxu0 %vm151_vm0, %v97_v43  ;;  %v267_v43 = vpop.permute.xlu0 %266 }
  0xa6   :  { %v263_v40 = vpop.permute.xlu1 %262 }
  0xa7   :  { %538 = vmatmul.msk.f32.gmra.mxu0 %vm151_vm0, %v98_v44  ;;  %v259_v44 = vpop.permute.xlu2 %258 }
  0xaf   :  { %539 = vmatmul.msk.f32.gmra.mxu0 %vm151_vm0, %v99_v45 }
  0xb7   :  { %540 = vmatmul.msk.f32.gmra.mxu0 %vm151_vm0, %v100_v46 }
 0x10c   :  { %v193_v47 = vpop.f32.mrf.mxu0 }
 0x10d   :  { %v194_v19 = vadd.f32 %v193_v47, %v114_v15 }
 0x10f   :  { %v217_v24 = vmul.f32 0.1, %v194_v19 }
 0x111   :  { %v225_v27 = vmax.f32 %v194_v19, %v217_v24 }
 0x112   :  { %v211_v48 = vpop.f32.mrf.mxu2 }
 0x113   :  { %v212_v51 = vadd.f32 %v211_v48, %v144_v50 }
 0x114   :  { %v196_v49 = vpop.f32.mrf.mxu0 }
 0x115   :  { %v223_v54 = vmul.f32 0.1, %v212_v51  ;;  %v197_v16 = vadd.f32 %v196_v49, %v119_v11  ;;  %v255_v49 = vpop.permute.xlu1 %254 }
 0x117   :  { %v231_v59 = vmax.f32 %v212_v51, %v223_v54  ;;  %v218_v22 = vmul.f32 0.1, %v197_v16 }
 0x119   :  { %v226_v26 = vmax.f32 %v197_v16, %v218_v22  ;;  %v357_v16 = vld [vmem:[%s856_s4 + $0x10] sm:$0xff] }
 0x11a   :  { %v214_v53 = vpop.f32.mrf.mxu2 }
 0x11b   :  { %v215_v55 = vadd.f32 %v214_v53, %v149_v52 }
 0x11c   :  { %v199_v56 = vpop.f32.mrf.mxu0 }
 0x11d   :  { %v224_v57 = vmul.f32 0.1, %v215_v55  ;;  %v200_v12 = vadd.f32 %v199_v56, %v124_v5  ;;  %v251_v56 = vpop.permute.xlu2 %250 }
 0x11f   :  { %v232_v58 = vmax.f32 %v215_v55, %v224_v57  ;;  %v219_v20 = vmul.f32 0.1, %v200_v12 }
 0x121   :  { %306 = vmatpush.msra.mxu1 %v232_v58  ;;  %560 = vmatpush.msra.mxu3 %v232_v58  ;;  %v227_v25 = vmax.f32 %v200_v12, %v219_v20 }
 0x123   :  { %307 = vmatpush.msra.mxu1 %v231_v59  ;;  %561 = vmatpush.msra.mxu3 %v231_v59  ;;  %v247_v59 = vpop.permute.xlu0 %246 }
 0x124   :  { %v202_v62 = vpop.f32.mrf.mxu0 }
 0x125   :  { %v203_v9 = vadd.f32 %v202_v62, %v129_v2 }
 0x127   :  { %v220_v17 = vmul.f32 0.1, %v203_v9 }
 0x129   :  { %v228_v23 = vmax.f32 %v203_v9, %v220_v17 }
 0x12c   :  { %v205_v1 = vpop.f32.mrf.mxu0 }
 0x12d   :  { %v206_v4 = vadd.f32 %v205_v1, %v134_v63  ;;  %v633_v63 = vmov 3   ;;  %v243_v1 = vpop.permute.xlu1 %242 }
 0x12e   :  { %600 = vset.pattern.permute.xlu1 %v633_v63  ;;  %599 = vset.pattern.permute.xlu0 %v633_v63 }
 0x12f   :  { %v221_v13 = vmul.f32 0.1, %v206_v4  ;;  %364 = vperm.xlu1 %600, %v718_v7   ;;  %598 = vset.pattern.permute.xlu2 %v633_v63 }
 0x130   :  { %368 = vperm.xlu0 %599, %v703_v3   ;;  %372 = vperm.xlu2 %598, %v694_v0   ;;  %v355_v3 = vld [vmem:[%s856_s4] sm:$0xff]  ;;  %v356_v0 = vld [vmem:[%s856_s4 + $0x8] sm:$0xff] }
 0x131   :  { %v229_v21 = vmax.f32 %v206_v4, %v221_v13 }
 0x134   :  { %v208_v6 = vpop.f32.mrf.mxu0 }
 0x135   :  { %v209_v10 = vadd.f32 %v208_v6, %v139_v61 }
 0x137   :  { %v222_v14 = vmul.f32 0.1, %v209_v10 }
 0x138   :  { %360 = vperm.xlu2 %598, %v723_v8   ;;  %v358_v8 = vld [vmem:[%s856_s4 + $0x18] sm:$0xff] }
 0x139   :  { %v230_v18 = vmax.f32 %v209_v10, %v222_v14 }
 0x13b   :  { %308 = vmatpush.msra.mxu1 %v230_v18  ;;  %562 = vmatpush.msra.mxu3 %v230_v18 }
 0x13d   :  { %309 = vmatpush.msra.mxu1 %v229_v21  ;;  %563 = vmatpush.msra.mxu3 %v229_v21 }
 0x13f   :  { %310 = vmatpush.msra.mxu1 %v228_v23  ;;  %564 = vmatpush.msra.mxu3 %v228_v23 }
 0x141   :  { %311 = vmatpush.msra.mxu1 %v227_v25  ;;  %565 = vmatpush.msra.mxu3 %v227_v25 }
 0x143   :  { %312 = vmatpush.msra.mxu1 %v226_v26  ;;  %566 = vmatpush.msra.mxu3 %v226_v26 }
 0x145   :  { %313 = vmatpush.msra.mxu1 %v225_v27  ;;  %567 = vmatpush.msra.mxu3 %v225_v27 }
 0x146   :  { %543 = vmatmul.msk.f32.vlgmr.msra.gmra.mxu1 %vm273_vm1, %v233_v28  ;;  %548 = vmatmul.msk.f32.vlgmr.msra.gmra.mxu3 %vm273_vm1, %v238_v29 }
 0x14e   :  { %544 = vmatmul.msk.f32.gmra.mxu1 %vm273_vm1, %v234_v30  ;;  %549 = vmatmul.msk.f32.gmra.mxu3 %vm273_vm1, %v239_v31 }
 0x156   :  { %545 = vmatmul.msk.f32.gmra.mxu1 %vm273_vm1, %v235_v32  ;;  %550 = vmatmul.msk.f32.gmra.mxu3 %vm273_vm1, %v240_v33 }
 0x15e   :  { %546 = vmatmul.msk.f32.gmra.mxu1 %vm273_vm1, %v236_v34 }
 0x166   :  { %547 = vmatmul.msk.f32.gmra.mxu1 %vm273_vm1, %v237_v35 }
 0x18a   :  { %v373_v19 = vpop.permute.xlu2 %372 }
 0x192   :  { %v361_v24 = vpop.permute.xlu2 %360 }
 0x1a1   :  { %v365_v22 = vpop.permute.xlu1 %364 }
 0x1a2   :  { %v369_v21 = vpop.permute.xlu0 %368 }
 0x1c3   :  { %v315_v36 = vpop.f32.mrf.mxu1 }
 0x1c4   :  { %v316_v6 = vadd.f32 %v315_v36, %v243_v1 }
 0x1c6   :  { %v339_v13 = vmul.f32 0.1, %v316_v6 }
 0x1c8   :  { %v347_v15 = vmax.f32 %v316_v6, %v339_v13 }
 0x1c9   :  { %v330_v37 = vpop.f32.mrf.mxu3 }
 0x1ca   :  { %v331_v47 = vadd.f32 %v330_v37, %v263_v40  ;;  %v424_v37 = vld [vmem:[%s857_s5] sm:$0x1]  ;;  %s641_s5 = smov 56  }
 0x1cb   :  { %v318_v38 = vpop.f32.mrf.mxu1  ;;  %v509_v40 = vld [vmem:[%s858_s6] sm:$0x1]  ;;  %s650_s6 = smov [#allocation2]  }
 0x1cc   :  { %v344_v53 = vmul.f32 0.1, %v331_v47  ;;  %v319_v2 = vadd.f32 %v318_v38, %v247_v59  ;;  %s524_s29 = sshll.u32 %s650_s6, 4  ;;  %s525_s29 = int_to_ptr.vmem [resolvable:$true] %s524_s29 }
 0x1ce   :  { %v352_v58 = vmax.f32 %v331_v47, %v344_v53  ;;  %v340_v11 = vmul.f32 0.1, %v319_v2 }
 0x1d0   :  { %v348_v7 = vmax.f32 %v319_v2, %v340_v11 }
 0x1d1   :  { %v333_v41 = vpop.f32.mrf.mxu3 }
 0x1d2   :  { %v334_v45 = vadd.f32 %v333_v41, %v267_v43  ;;  %v510_v41 = vmul.f32 16.0, %v509_v40 }
 0x1d3   :  { %v321_v42 = vpop.f32.mrf.mxu1 }
 0x1d4   :  { %v345_v51 = vmul.f32 0.1, %v334_v45  ;;  %v322_v61 = vadd.f32 %v321_v42, %v251_v56 }
 0x1d6   :  { %v353_v55 = vmax.f32 %v334_v45, %v345_v51  ;;  %v341_v9 = vmul.f32 0.1, %v322_v61 }
 0x1d8   :  { %v349_v14 = vmax.f32 %v322_v61, %v341_v9 }
 0x1d9   :  { %v336_v46 = vpop.f32.mrf.mxu3 }
 0x1da   :  { %v337_v48 = vadd.f32 %v336_v46, %v271_v39  ;;  %v637_v39 = vmov 4  }
 0x1db   :  { %v324_v50 = vpop.f32.mrf.mxu1  ;;  %601 = vset.pattern.permute.xlu1 %v637_v39  ;;  %602 = vset.pattern.permute.xlu0 %v637_v39 }
 0x1dc   :  { %v346_v52 = vmul.f32 0.1, %v337_v48  ;;  %v325_v57 = vadd.f32 %v324_v50, %v255_v49 }
 0x1de   :  { %v354_v54 = vmax.f32 %v337_v48, %v346_v52  ;;  %v342_v4 = vmul.f32 0.1, %v325_v57 }
 0x1e0   :  { %395 = vmatpush.msrb.mxu2 %v354_v54  ;;  %v350_v12 = vmax.f32 %v325_v57, %v342_v4 }
 0x1e2   :  { %396 = vmatpush.msrb.mxu2 %v353_v55 }
 0x1e3   :  { %v327_v60 = vpop.f32.mrf.mxu1 }
 0x1e4   :  { %v328_v62 = vadd.f32 %v327_v60, %v259_v44  ;;  %397 = vmatpush.msrb.mxu2 %v352_v58 }
 0x1e6   :  { %v343_v5 = vmul.f32 0.1, %v328_v62 }
 0x1e8   :  { %v351_v10 = vmax.f32 %v328_v62, %v343_v5 }
 0x1ea   :  { %398 = vmatpush.msrb.mxu2 %v351_v10 }
 0x1ec   :  { %399 = vmatpush.msrb.mxu2 %v350_v12 }
 0x1ee   :  { %400 = vmatpush.msrb.mxu2 %v349_v14 }
 0x1f0   :  { %401 = vmatpush.msrb.mxu2 %v348_v7 }
 0x1f2   :  { %402 = vmatpush.msrb.mxu2 %v347_v15 }
 0x1f3   :  { %551 = vmatmul.msk.f32.vlgmr.msrb.gmra.mxu2 %vm273_vm1, %v355_v3 }
 0x1fb   :  { %552 = vmatmul.msk.f32.gmra.mxu2 %vm273_vm1, %v356_v0 }
 0x203   :  { %553 = vmatmul.msk.f32.gmra.mxu2 %vm273_vm1, %v357_v16 }
 0x20b   :  { %554 = vmatmul.msk.f32.gmra.mxu2 %vm273_vm1, %v358_v8 }
 0x276   :  { %v404_v17 = vpop.f32.mrf.mxu2 }
 0x277   :  { %v405_v28 = vadd.f32 %v404_v17, %v361_v24 }
 0x279   :  { %v416_v33 = vmul.f32 0.1, %v405_v28 }
 0x27b   :  { %v420_v36 = vmax.f32 %v405_v28, %v416_v33 }
 0x27e   :  { %v407_v18 = vpop.f32.mrf.mxu2 }
 0x27f   :  { %v408_v26 = vadd.f32 %v407_v18, %v365_v22 }
 0x281   :  { %v417_v31 = vmul.f32 0.1, %v408_v26 }
 0x283   :  { %v421_v35 = vmax.f32 %v408_v26, %v417_v31 }
 0x286   :  { %v410_v20 = vpop.f32.mrf.mxu2 }
 0x287   :  { %v411_v23 = vadd.f32 %v410_v20, %v369_v21 }
 0x289   :  { %v418_v29 = vmul.f32 0.1, %v411_v23 }
 0x28b   :  { %v422_v34 = vmax.f32 %v411_v23, %v418_v29 }
 0x28e   :  { %v413_v25 = vpop.f32.mrf.mxu2 }
 0x28f   :  { %v414_v27 = vadd.f32 %v413_v25, %v373_v19 }
 0x291   :  { %v419_v30 = vmul.f32 0.1, %v414_v27 }
 0x293   :  { %v423_v32 = vmax.f32 %v414_v27, %v419_v30 }
 0x295   :  { %440 = vmatpush.msrb.mxu3 %v423_v32 }
 0x297   :  { %441 = vmatpush.msrb.mxu3 %v422_v34 }
 0x299   :  { %442 = vmatpush.msrb.mxu3 %v421_v35 }
 0x29b   :  { %443 = vmatpush.msrb.mxu3 %v420_v36 }
 0x29c   :  { %555 = vmatmul.msk.f32.vlgmr.msrb.gmra.mxu3 %vm151_vm0, %v424_v37 }
 0x31f   :  { %v445_v38 = vpop.f32.mrf.mxu3 }
 0x320   :  { %457 = vrot.lane.b32.xlu0 %v445_v38, %s634_s16  ;;  %453 = vrot.lane.b32.xlu2 %v445_v38, %s635_s17 }
 0x321   :  { %449 = vrot.lane.b32.xlu1 %v445_v38, %s636_s2 }
 0x328   :  { %469 = vrot.lane.b32.xlu0 %v445_v38, %s638_s18  ;;  %465 = vrot.lane.b32.xlu2 %v445_v38, %s639_s1 }
 0x329   :  { %461 = vrot.lane.b32.xlu1 %v445_v38, %s640_s19 }
 0x330   :  { %481 = vrot.lane.b32.xlu0 %v445_v38, %s641_s5  ;;  %477 = vrot.lane.b32.xlu2 %v445_v38, %s642_s20 }
 0x331   :  { %473 = vrot.lane.b32.xlu1 %v445_v38, %s643_s21 }
 0x338   :  { %493 = vrot.lane.b32.xlu0 %v445_v38, %s644_s0  ;;  %489 = vrot.lane.b32.xlu2 %v445_v38, %s645_s22 }
 0x339   :  { %485 = vrot.lane.b32.xlu1 %v445_v38, %s646_s23 }
 0x340   :  { %505 = vrot.lane.b32.xlu0 %v445_v38, %s647_s24  ;;  %501 = vrot.lane.b32.xlu2 %v445_v38, %s648_s25 }
 0x341   :  { %497 = vrot.lane.b32.xlu1 %v445_v38, %s649_s26 }
 0x349   :  { %513 = vperm.xlu1 %601, %v510_v41  }
 0x37a   :  { %v454_v42 = vpop.permute.xlu2 %453 }
 0x382   :  { %v466_v47 = vpop.permute.xlu2 %465 }
 0x38a   :  { %v478_v53 = vpop.permute.xlu2 %477 }
 0x392   :  { %v458_v43 = vpop.permute.xlu0 %457  ;;  %v490_v60 = vpop.permute.xlu2 %489 }
 0x393   :  { %v450_v44 = vpop.permute.xlu1 %449 }
 0x394   :  { %v452_v45 = vadd.f32 %v450_v44, %v445_v38 }
 0x396   :  { %v456_v46 = vadd.f32 %v454_v42, %v452_v45 }
 0x398   :  { %v460_v48 = vadd.f32 %v458_v43, %v456_v46 }
 0x39a   :  { %v470_v49 = vpop.permute.xlu0 %469  ;;  %v502_v6 = vpop.permute.xlu2 %501 }
 0x39b   :  { %v462_v50 = vpop.permute.xlu1 %461 }
 0x39c   :  { %v464_v51 = vadd.f32 %v462_v50, %v460_v48 }
 0x39e   :  { %v468_v52 = vadd.f32 %v466_v47, %v464_v51 }
 0x3a0   :  { %v472_v54 = vadd.f32 %v470_v49, %v468_v52 }
 0x3a2   :  { %v482_v57 = vpop.permute.xlu0 %481 }
 0x3a3   :  { %v474_v55 = vpop.permute.xlu1 %473 }
 0x3a4   :  { %v476_v56 = vadd.f32 %v474_v55, %v472_v54 }
 0x3a6   :  { %v480_v58 = vadd.f32 %v478_v53, %v476_v56 }
 0x3a8   :  { %v484_v59 = vadd.f32 %v482_v57, %v480_v58 }
 0x3aa   :  { %v494_v1 = vpop.permute.xlu0 %493 }
 0x3ab   :  { %v486_v61 = vpop.permute.xlu1 %485 }
 0x3ac   :  { %v488_v62 = vadd.f32 %v486_v61, %v484_v59 }
 0x3ae   :  { %v492_v63 = vadd.f32 %v490_v60, %v488_v62 }
 0x3b0   :  { %v496_v2 = vadd.f32 %v494_v1, %v492_v63 }
 0x3b2   :  { %v506_v10 = vpop.permute.xlu0 %505 }
 0x3b3   :  { %v498_v4 = vpop.permute.xlu1 %497 }
 0x3b4   :  { %v500_v5 = vadd.f32 %v498_v4, %v496_v2 }
 0x3b6   :  { %v504_v9 = vadd.f32 %v502_v6, %v500_v5 }
 0x3b8   :  { %v508_v11 = vadd.f32 %v506_v10, %v504_v9 }
 0x3bb   :  { %v514_v12 = vpop.permute.xlu1 %513 }
 0x3bc   :  { %v516_v13 = vadd.f32 %v514_v12, %v508_v11 }
 0x3be   :  { %518 = vst.msk [vmem:[#allocation2] sm:$0x1] %vm517_vm2, %v516_v13 }
 0x3bf   :  { %529 = dma.vmem_to_hbm [thread:$0]  %s525_s29, 16, %s527_s8, [#allocation3]  }
 0x3c0   :  { %628 = dma.done.wait [#allocation3], 16  }
 0x3c1   :  { %629 = vsyncadd [#allocation3], 4294967280 }
 0x3c2   :  { %534 = vsyncpa [#allocation3], 1 }

</bundles_post_ra>
